<compile_context>
chip_gen: v7x
topology: tpu7x:2x2x1
jax: 0.10.0
libtpu: 0.0.40
codegen_flags: <defaults>
</compile_context>

<pallas_src>
import numpy as np
import jax
import jax.numpy as jnp
from jax import lax
from jax.experimental import pallas as pl
from jax.experimental.pallas import tpu as pltpu


def interp_matrix_np(out_size: int, in_size: int) -> np.ndarray:
    """Row-stochastic 1-D linear interpolation matrix, align_corners=True (NumPy)."""
    a = np.zeros((out_size, in_size), np.float32)
    if out_size == 1 or in_size == 1:
        a[:, 0] = 1.0
        return a
    idx = np.arange(out_size, dtype=np.float64)
    src = idx * (in_size - 1) / (out_size - 1)
    lo = np.clip(np.floor(src).astype(np.int64), 0, in_size - 1)
    hi = np.minimum(lo + 1, in_size - 1)
    frac = (src - lo).astype(np.float32)
    rows = np.arange(out_size)
    np.add.at(a, (rows, lo), 1.0 - frac)
    np.add.at(a, (rows, hi), frac)
    return a


def upsample_conv_kernel(x_ref, awt_ref, aht_ref, w_ref, b_ref, o_ref):
    # x_ref  : [Nb, C_in, H, W]        (block of batch elements)
    # awt_ref: [W, W_out]              (1-D interp matrix along W, transposed)
    # aht_ref: [H, H_out]              (1-D interp matrix along H, transposed)
    # w_ref  : [C_out, C_in]           (1x1 conv weight)
    # b_ref  : [C_out, 1]              (conv bias)
    # o_ref  : [Nb, C_out, H_out*W_out]
    nb, c_in, h, w = x_ref.shape
    w_out = awt_ref.shape[1]
    h_out = aht_ref.shape[1]
    c_out = w_ref.shape[0]

    # Cast (if needed) on data already resident in VMEM; no-op for f32 input.
    x = x_ref[...].astype(jnp.float32)                               # [Nb, C_in, H, W]

    # --- separable bilinear interpolation, batch folded into M ---
    # W axis: contract W against [W, W_out]; M = Nb*C_in*H.
    uw = jnp.dot(x.reshape(nb * c_in * h, w), awt_ref[...],
                 preferred_element_type=jnp.float32)                 # [Nb*C_in*H, W_out]

    # H axis: bring H to the contraction (lane) position; M = Nb*C_in*W_out.
    uw_t = jnp.swapaxes(uw.reshape(nb * c_in, h, w_out), 1, 2)       # [Nb*C_in, W_out, H]
    uh = jnp.dot(uw_t.reshape(nb * c_in * w_out, h), aht_ref[...],
                 preferred_element_type=jnp.float32)                 # [Nb*C_in*W_out, H_out]

    # Restore (H_out, W_out) order and flatten to the lane-dense spatial layout
    # expected by the output block (single relayout, done on the C_in-channel
    # tensor, i.e. before the channel expansion in the conv).
    up = jnp.swapaxes(uh.reshape(nb * c_in, w_out, h_out), 1, 2)     # [Nb*C_in, H_out, W_out]
    up = up.reshape(nb, c_in, h_out * w_out)                         # [Nb, C_in, S]

    # --- 1x1 conv (channel mix) as a batched dot_general, lane dim stays S ---
    w_b = jnp.broadcast_to(w_ref[...][None], (nb, c_out, c_in))      # tiny
    out = lax.dot_general(
        w_b, up,
        dimension_numbers=(((2,), (1,)), ((0,), (0,))),
        preferred_element_type=jnp.float32)                          # [Nb, C_out, S]
    out = out + b_ref[...]                                           # bias broadcast
    o_ref[...] = out.astype(o_ref.dtype)


def _pick_block_batch(N, C_in, C_out, H, W, H_out, W_out, itemsize=4):
    """Choose Nb (batch elements per grid step).

    Budget: double-buffered input+output blocks plus in-kernel intermediates
    must stay well under v5e's 16 MiB default scoped VMEM (v6e: 32 MiB,
    v7x: 32 MiB default / 64 MiB physical).  Also keep the grid length >= 2 so
    v7x's two TensorCores both get work when N >= 2.
    """
    io_per_elem = 2 * (C_in * H * W + C_out * H_out * W_out) * itemsize
    interm_per_elem = (C_in * H * W_out                # uw
                       + 2 * C_in * W_out * H          # uw_t (+ slack)
                       + 2 * C_in * W_out * H_out      # uh + relayout temp
                       + C_in * H_out * W_out          # up (flat)
                       + C_out * H_out * W_out         # conv result before store
                       ) * itemsize
    budget = 12 * 1024 * 1024
    nb_vmem = max(1, budget // (io_per_elem + interm_per_elem))
    nb = min(nb_vmem, max(1, N // 2), N)
    while N % nb:                                       # keep Nb a divisor of N
        nb -= 1
    return max(nb, 1)


def upsampling_module_forward(x, conv_w, conv_b, scale_factor=2):
    """x: [N, C_in, H, W] (NCHW).  conv_w: [C_out, C_in].  conv_b: [C_out]."""
    N, C_in, H, W = x.shape
    C_out = conv_w.shape[0]
    H_out, W_out = H * scale_factor, W * scale_factor
    S = H_out * W_out

    Nb = _pick_block_batch(N, C_in, C_out, H, W, H_out, W_out)
    grid = (N // Nb,)

    # Host-side (NumPy) constants: tiny 1-D interpolation matrices, transposed.
    a_wt = jnp.asarray(interp_matrix_np(W_out, W).T)   # [W, W_out]
    a_ht = jnp.asarray(interp_matrix_np(H_out, H).T)   # [H, H_out]

    w_f32 = conv_w.astype(jnp.float32)
    b2d = conv_b.reshape(C_out, 1).astype(jnp.float32)

    flops = 2 * N * (C_in * H * W * W_out
                     + C_in * W_out * H * H_out
                     + C_out * C_in * S)
    bytes_accessed = (x.size * x.dtype.itemsize
                      + N * C_out * S * 4
                      + (a_wt.size + a_ht.size + w_f32.size + b2d.size) * 4)

    out = pl.pallas_call(
        upsample_conv_kernel,
        out_shape=jax.ShapeDtypeStruct((N, C_out, S), jnp.float32),
        grid_spec=pltpu.PrefetchScalarGridSpec(
            num_scalar_prefetch=0,
            grid=grid,
            in_specs=[
                pl.BlockSpec((Nb, C_in, H, W), lambda n: (n, 0, 0, 0)),
                pl.BlockSpec((W, W_out), lambda n: (0, 0)),
                pl.BlockSpec((H, H_out), lambda n: (0, 0)),
                pl.BlockSpec((C_out, C_in), lambda n: (0, 0)),
                pl.BlockSpec((C_out, 1), lambda n: (0, 0)),
            ],
            out_specs=pl.BlockSpec((Nb, C_out, S), lambda n: (n, 0, 0)),
        ),
        compiler_params=pltpu.CompilerParams(
            dimension_semantics=("parallel",)),
        cost_estimate=pl.CostEstimate(
            flops=flops, transcendentals=0, bytes_accessed=bytes_accessed),
    )(x, a_wt, a_ht, w_f32, b2d)

    return out.reshape(N, C_out, H_out, W_out)


def reference_forward(x, conv_w, conv_b, scale_factor=2):
    """Pure-JAX reference: per-axis interpolation then 1x1 conv."""
    N, C_in, H, W = x.shape
    H_out, W_out = H * scale_factor, W * scale_factor
    a_h = jnp.asarray(interp_matrix_np(H_out, H))
    a_w = jnp.asarray(interp_matrix_np(W_out, W))
    xf = x.astype(jnp.float32)
    up = jnp.einsum('oh,nchw->ncow', a_h, xf)
    up = jnp.einsum('pw,nchw->nchp', a_w, up)          # [N, C_in, H_out, W_out]
    out = jnp.einsum('kc,nchw->nkhw', conv_w.astype(jnp.float32), up)
    return out + conv_b.astype(jnp.float32)[None, :, None, None]


if __name__ == "__main__":
    N, C_in, C_out, H, W = 2, 4, 8, 16, 16
    key = jax.random.PRNGKey(0)
    k_x, k_w, k_b = jax.random.split(key, 3)

    x = jax.random.normal(k_x, (N, C_in, H, W), jnp.float32)
    conv_w = jax.random.normal(k_w, (C_out, C_in), jnp.float32) * 0.1   # 1x1 conv weight
    conv_b = jax.random.normal(k_b, (C_out,), jnp.float32) * 0.1

    out = upsampling_module_forward(x, conv_w, conv_b)
    out = jax.block_until_ready(out)

    ref = reference_forward(x, conv_w, conv_b)
    assert out.shape == (N, C_out, 2 * H, 2 * W), out.shape
    if not jnp.allclose(out, ref, rtol=1e-4, atol=1e-4):
        raise AssertionError("Pallas kernel output does not match reference")

    print("KERNEL_OK")
</pallas_src>

<mosaic_0001>
module attributes {stable_mosaic.version = 11 : i64} {
  func.func @upsample_conv_kernel(%arg0: i32, %arg1: memref<1x4x16x16xf32, #tpu.memory_space<vmem>>, %arg2: memref<16x32xf32, #tpu.memory_space<vmem>>, %arg3: memref<16x32xf32, #tpu.memory_space<vmem>>, %arg4: memref<8x4xf32, #tpu.memory_space<vmem>>, %arg5: memref<8x1xf32, #tpu.memory_space<vmem>>, %arg6: memref<1x8x1024xf32, #tpu.memory_space<vmem>>) attributes {dimension_semantics = [#tpu.dimension_semantics<parallel>], iteration_bounds = array<i64: 2>, scalar_prefetch = 0 : i64, scratch_operands = 0 : i64, tpu.core_type = #tpu.core_type<tc>, window_params = [{transform_indices = @transform_0, window_bounds = array<i64: 1, 4, 16, 16>}, {pipeline_mode = #tpu.pipeline_mode<synchronous>, transform_indices = @transform_1, window_bounds = array<i64: 16, 32>}, {pipeline_mode = #tpu.pipeline_mode<synchronous>, transform_indices = @transform_2, window_bounds = array<i64: 16, 32>}, {pipeline_mode = #tpu.pipeline_mode<synchronous>, transform_indices = @transform_3, window_bounds = array<i64: 8, 4>}, {pipeline_mode = #tpu.pipeline_mode<synchronous>, transform_indices = @transform_4, window_bounds = array<i64: 8, 1>}, {transform_indices = @transform_5, window_bounds = array<i64: 1, 8, 1024>}]} {
    %c0 = arith.constant 0 : index
    %c0_0 = arith.constant 0 : index
    %c0_1 = arith.constant 0 : index
    %c0_2 = arith.constant 0 : index
    %0 = vector.load %arg1[%c0, %c0_0, %c0_1, %c0_2] : memref<1x4x16x16xf32, #tpu.memory_space<vmem>>, vector<1x4x16x16xf32>
    %1 = vector.shape_cast %0 : vector<1x4x16x16xf32> to vector<64x16xf32>
    %c0_3 = arith.constant 0 : index
    %c0_4 = arith.constant 0 : index
    %2 = vector.load %arg2[%c0_3, %c0_4] : memref<16x32xf32, #tpu.memory_space<vmem>>, vector<16x32xf32>
    %cst = arith.constant dense<0.000000e+00> : vector<64x32xf32>
    %3 = tpu.matmul %1, %2, %cst {dimension_numbers = #tpu.dot_dimension_numbers<[1], [0], [0], [1], [0, 0, 1, 1], [], []>} : vector<64x16xf32>, vector<16x32xf32>, vector<64x32xf32> -> vector<64x32xf32>
    %4 = vector.shape_cast %3 : vector<64x32xf32> to vector<4x16x32xf32>
    %5 = tpu.transpose %4, [0, 2, 1] : vector<4x16x32xf32> -> vector<4x32x16xf32>
    %6 = vector.shape_cast %5 : vector<4x32x16xf32> to vector<128x16xf32>
    %c0_5 = arith.constant 0 : index
    %c0_6 = arith.constant 0 : index
    %7 = vector.load %arg3[%c0_5, %c0_6] : memref<16x32xf32, #tpu.memory_space<vmem>>, vector<16x32xf32>
    %cst_7 = arith.constant dense<0.000000e+00> : vector<128x32xf32>
    %8 = tpu.matmul %6, %7, %cst_7 {dimension_numbers = #tpu.dot_dimension_numbers<[1], [0], [0], [1], [0, 0, 1, 1], [], []>} : vector<128x16xf32>, vector<16x32xf32>, vector<128x32xf32> -> vector<128x32xf32>
    %9 = vector.shape_cast %8 : vector<128x32xf32> to vector<4x32x32xf32>
    %10 = tpu.transpose %9, [0, 2, 1] : vector<4x32x32xf32> -> vector<4x32x32xf32>
    %11 = vector.shape_cast %10 : vector<4x32x32xf32> to vector<1x4x1024xf32>
    %c0_8 = arith.constant 0 : index
    %c0_9 = arith.constant 0 : index
    %12 = vector.load %arg4[%c0_8, %c0_9] : memref<8x4xf32, #tpu.memory_space<vmem>>, vector<8x4xf32>
    %13 = vector.shape_cast %12 : vector<8x4xf32> to vector<1x8x4xf32>
    %cst_10 = arith.constant dense<0.000000e+00> : vector<1x8x1024xf32>
    %14 = tpu.matmul %13, %11, %cst_10 {dimension_numbers = #tpu.dot_dimension_numbers<[2], [1], [1], [2], [0, 0, 0, 1, 1, 2], [0], [0]>} : vector<1x8x4xf32>, vector<1x4x1024xf32>, vector<1x8x1024xf32> -> vector<1x8x1024xf32>
    %c0_11 = arith.constant 0 : index
    %c0_12 = arith.constant 0 : index
    %15 = vector.load %arg5[%c0_11, %c0_12] : memref<8x1xf32, #tpu.memory_space<vmem>>, vector<8x1xf32>
    %16 = vector.shape_cast %15 : vector<8x1xf32> to vector<1x8x1xf32>
    %17 = vector.broadcast %16 : vector<1x8x1xf32> to vector<1x8x1024xf32>
    %18 = arith.addf %14, %17 : vector<1x8x1024xf32>
    %c0_13 = arith.constant 0 : index
    %c0_14 = arith.constant 0 : index
    %c0_15 = arith.constant 0 : index
    %19 = vector.load %arg6[%c0_13, %c0_14, %c0_15] : memref<1x8x1024xf32, #tpu.memory_space<vmem>>, vector<1x8x1024xf32>
    tpu.vector_store %arg6[%c0_13, %c0_14, %c0_15], %18 {strides = array<i32>} : memref<1x8x1024xf32, #tpu.memory_space<vmem>>, vector<1x8x1024xf32>,
    return
  }
  func.func @transform_0(%arg0: i32) -> (i32, i32, i32, i32) {
    %c0_i32 = arith.constant 0 : i32
    %c0_i32_0 = arith.constant 0 : i32
    %c0_i32_1 = arith.constant 0 : i32
    %c0_i32_2 = arith.constant 0 : i32
    return %arg0, %c0_i32, %c0_i32_0, %c0_i32_1 : i32, i32, i32, i32
  }
  func.func @transform_1(%arg0: i32) -> (i32, i32) {
    %c0_i32 = arith.constant 0 : i32
    %c0_i32_0 = arith.constant 0 : i32
    %c0_i32_1 = arith.constant 0 : i32
    return %c0_i32, %c0_i32_0 : i32, i32
  }
  func.func @transform_2(%arg0: i32) -> (i32, i32) {
    %c0_i32 = arith.constant 0 : i32
    %c0_i32_0 = arith.constant 0 : i32
    %c0_i32_1 = arith.constant 0 : i32
    return %c0_i32, %c0_i32_0 : i32, i32
  }
  func.func @transform_3(%arg0: i32) -> (i32, i32) {
    %c0_i32 = arith.constant 0 : i32
    %c0_i32_0 = arith.constant 0 : i32
    %c0_i32_1 = arith.constant 0 : i32
    return %c0_i32, %c0_i32_0 : i32, i32
  }
  func.func @transform_4(%arg0: i32) -> (i32, i32) {
    %c0_i32 = arith.constant 0 : i32
    %c0_i32_0 = arith.constant 0 : i32
    %c0_i32_1 = arith.constant 0 : i32
    return %c0_i32, %c0_i32_0 : i32, i32
  }
  func.func @transform_5(%arg0: i32) -> (i32, i32, i32) {
    %c0_i32 = arith.constant 0 : i32
    %c0_i32_0 = arith.constant 0 : i32
    %c0_i32_1 = arith.constant 0 : i32
    return %arg0, %c0_i32, %c0_i32_0 : i32, i32, i32
  }
}

</mosaic_0001>

<bundles_post_ra>
// kernel: tpu_custom_call.1
= control target key start
LH: loop header
LB: loop body
LE: loop exit
PB: predicated region body
PF: predicated region fallthrough
CT: control target
= control target key end

     0   :  { %10 = vsyncpa [#allocation3], 0  ;;  %s2450_s0 = inlined_call_operand.hbm [shape: f32[2,4,16,16], index: 0, kind: input, shape index: {}]   ;;  %s2451_s1 = inlined_call_operand.vmem [shape: f32[16,32], index: 1, kind: input, shape index: {}]   ;;  %s2452_s2 = inlined_call_operand.hbm [shape: f32[16,32], index: 2, kind: input, shape index: {}]   ;;  %s2453_s3 = inlined_call_operand.vmem [shape: f32[8,4], index: 3, kind: input, shape index: {}]   ;;  %s2454_s4 = inlined_call_operand.vmem [shape: f32[8,1], index: 4, kind: input, shape index: {}]   ;;  %s2455_s5 = inlined_call_operand.hbm [shape: f32[2,8,1024], index: 5, kind: output, shape index: {}]  }
   0x1   :  { %12 = vsyncpa [#allocation3 + $0x1], 0 }
   0x2   :  { %13 = vsyncpa [#allocation6], 0 }
   0x3   :  { %14 = vsyncpa [#allocation4], 0 }
   0x4   :  { %16 = vsyncpa [#allocation4 + $0x1], 0  ;;  %s2041_s18 = smov 0   ;;  %s2043_s19 = smov 0  }
   0x5   :  { %s2045_s20 = smov 0   ;;  %s2047_s21 = smov 0  }
   0x6 LB: > { %s2062_s22 = sadd.s32 4294967295, %s1997_s21   ;;  %s1667_s23 = sadd.s32 4294967294, %s1997_s21   ;;  %s1997_s21 = sphi %s2047_s21, %s2475_s21   ;;  %s1993_s20 = sphi %s2045_s20, %s2474_s20   ;;  %s1989_s19 = sphi %s2043_s19, %s2473_s19   ;;  %s1985_s18 = sphi %s2041_s18, %s2472_s18  }
   0x7   : > { %p42_p0 = scmp.ne.s32.totalorder %s1989_s19, %s1985_s18  ;;  %p2456_p1 = scmp.eq.s32.totalorder %s2062_s22, 0 }
   0x8   : > { %p156_p3 = scmp.eq.s32.totalorder %s1667_s23, 1  ;;  %p1668_p5 = scmp.ge.s32.totalorder %s1997_s21, 1 }
   0x9   : > { %p2071_p4 = por %p2456_p1, %p42_p0  ;;  %p163_p7 = scmp.lt.s32.totalorder %s1997_s21, 3 }
   0xa   : > { %p2076_p6 = por %p156_p3, %p42_p0  ;;  %s1999_s27 = smov [#allocation5]  }
   0xb   : > { %s2459_s24 = scalar_select %p2071_p4, 1, 0 }
   0xc   : > { %s2460_s25 = scalar_select %p2076_p6, 1, 0 }
   0xd   : > { %p2081_p8 = pnand %p1668_p5, %p163_p7  ;;  %s178_s28 = sshll.u32 %s1999_s27, 4  ;;  %s2085_s28 = int_to_ptr.vmem [resolvable:$true] %s178_s28 }
   0xe   : > { %s2097_s30 = sadd.s32 1, %s1997_s21   ;;  %s29_s6 = sadd.s32 1, %s1993_s20 }
   0xf   : > { %s2461_s26 = scalar_select %p2081_p8, 1, 0 }
  0x10   : > { %p1809_p9 = pneg %p2081_p8  ;;  %s26_s7 = ssub.s32 %s1997_s21, %s2097_s30 }
  0x11   : > { %s1869_s10 = scalar_lea.hbm %s2452_s2, 256 }
  0x12   : > { %p2092_p11 = pnand %p1809_p9, %p2456_p1  ;;  %p1870_p12 = scmp.ne.s32.totalorder %s2452_s2, %s1869_s10 }
  0x13   : > { %p1876_p5 = scmp.lt.u32.totalorder %s1869_s10, %s2452_s2 }
  0x14   : > { %p1871_p13 = pneg %p2092_p11 }
  0x16   : > { %p1872_p0 = pnand %p1871_p13, %p1870_p12 }
  0x18   : > { %p1873_p3 = pneg %p1872_p0 }
  0x1a   : > { %p1878_p7 = pnand %p1876_p5, %p1873_p3 }
  0x1c   : > { %1881 = shalt.err (!%p1878_p7)
}
  0x1d   : > { %s1882_s15 = scalar_lea.vmem %s2085_s28, 256  ;;  %p1890_p2 = scmp.lt.s32.totalorder %s2085_s28, %s2085_s28 }
  0x1e   : > { %p1883_p9 = scmp.ne.s32.totalorder %s2085_s28, %s1882_s15  ;;  %p1891_p6 = scmp.lt.s32.totalorder %s1882_s15, %s1882_s15 }
  0x20   : > { %p1885_p10 = pnand %p1883_p9, %p1871_p13  ;;  %p1892_p4 = por %p1891_p6, %p1890_p2 }
  0x22   : > { %p1886_p1 = pneg %p1885_p10 }
  0x24   : > { %p1893_p8 = pnand %p1892_p4, %p1886_p1 }
  0x26   : > { %1896 = shalt.err (!%p1893_p8)
}
  0x27   : > { %s2000_s16 = smov 128   ;;  %s2001_s17 = smov 8  }
  0x28   : > { %1812 = dma.hbm_to_vmem [thread:$0]  (!%p2092_p11), %s2452_s2, 256, %s2085_s28, [#allocation6], %s2000_s16, %s2000_s16, %s2001_s17  }
  0x29   : > { %p27_p1 = scmp.eq.s32.totalorder %s26_s7, 0  ;;  %p36_p2 = scmp.ne.s32.totalorder %s1993_s20, %s1989_s19 }
  0x2a   : > { %p37_p4 = scmp.eq.s32.totalorder %s1997_s21, 0  ;;  %p1822_p6 = scmp.lt.s32.totalorder %s1997_s21, 2 }
  0x2b   : > { %s2131_s8 = scalar_select %p27_p1, %s1993_s20, %s29_s6  }
  0x2c   : > { %p38_p8 = por %p37_p4, %p36_p2  ;;  %p2463_p10 = scmp.eq.s32.totalorder %s2062_s22, 1 }
  0x2d   : > { %s198_s29 = sand.u32 1, %s1993_s20   ;;  %s1719_s10 = sshll.u32 %s1997_s21, 10 }
  0x2e   : > { %p2135_p12 = por %p2463_p10, %p36_p2  ;;  %s1671_s11 = sshll.u32 %s198_s29, 6 }
  0x2f   : > { %s2144_s14 = scalar_lea.hbm %s2450_s0, %s1719_s10  ;;  %s202_s28 = scalar_lea.vmem [#allocation2], %s1671_s11 }
  0x30   : > { %s209_s6 = sshll.u32 %s202_s28, 4  ;;  %p2146_p11 = pnand %p1822_p6, %p38_p8  ;;  %s2150_s6 = int_to_ptr.vmem [resolvable:$true] %s209_s6 }
  0x31   : > { %s2152_s15 = scalar_lea.sflag [#allocation3], %s198_s29  ;;  %s1897_s23 = scalar_lea.hbm %s2144_s14, 1024 }
  0x32   : > { %p1898_p13 = scmp.ne.s32.totalorder %s2144_s14, %s1897_s23  ;;  %p1899_p0 = pneg %p2146_p11 }
  0x33   : > { %s1902_s11 = scalar_lea.hbm %s2450_s0, 2048  ;;  %p1903_p7 = scmp.lt.u32.totalorder %s2144_s14, %s2450_s0 }
  0x34   : > { %p1900_p3 = pnand %p1899_p0, %p1898_p13  ;;  %p1904_p9 = scmp.lt.u32.totalorder %s1902_s11, %s1897_s23 }
  0x35   : > { %p1906_p2 = scmp.lt.u32.totalorder %s1897_s23, %s2144_s14 }
  0x36   : > { %p1901_p5 = pneg %p1900_p3  ;;  %p1905_p1 = por %p1904_p9, %p1903_p7 }
  0x38   : > { %p1907_p4 = por %p1906_p2, %p1905_p1 }
  0x3a   : > { %p1908_p6 = pnand %p1907_p4, %p1901_p5 }
  0x3c   : > { %1911 = shalt.err (!%p1908_p6)
}
  0x3d   : > { %s1912_s29 = scalar_lea.vmem %s2150_s6, 1024  ;;  %s2002_s28 = smov [#allocation2]  }
  0x3e   : > { %p1913_p8 = scmp.ne.s32.totalorder %s2150_s6, %s1912_s29  ;;  %s1917_s27 = sshll.u32 %s2002_s28, 4  ;;  %s1918_s27 = int_to_ptr.vmem [resolvable:$false] %s1917_s27 }
  0x3f   : > { %s1919_s10 = scalar_lea.vmem %s1918_s27, 2048  ;;  %p1920_p3 = scmp.lt.s32.totalorder %s2150_s6, %s1918_s27 }
  0x40   : > { %p1915_p10 = pnand %p1913_p8, %p1899_p0  ;;  %p1921_p7 = scmp.lt.s32.totalorder %s1919_s10, %s1912_s29 }
  0x42   : > { %p1916_p13 = pneg %p1915_p10  ;;  %p1922_p9 = por %p1921_p7, %p1920_p3 }
  0x44   : > { %p1923_p1 = pnand %p1922_p9, %p1916_p13 }
  0x46   : > { %1926 = shalt.err (!%p1923_p1)
}
  0x47   : > { %1816 = dma.hbm_to_vmem [thread:$0]  (!%p2146_p11), %s2144_s14, 1024, %s2150_s6, %s2152_s15, %s2000_s16, %s2000_s16, %s2001_s17  }
  0x48   : > { %p2466_p0 = scmp.ne.s32.totalorder %s2461_s26, 0 }
  0x49   : > { %s2186_s23 = sand.u32 (!%p2466_p0), 1, %s1989_s19   ;;  %p2467_p5 = scmp.ne.s32.totalorder (!%p2466_p0), %s2459_s24, 0 }
  0x4a   : > { %221 = sbr.rel (%p2466_p0) target bundleno = 1211 (0x4bb), region = 40  ;;  %s1675_s11 = sshll.u32 (!%p2466_p0), %s2186_s23, 6 }
  0x4b   : > { %s224_s12 = scalar_lea.sflag (!%p2466_p0), [#allocation3], %s2186_s23  ;;  %s227_s7 = scalar_lea.vmem (!%p2466_p0), [#allocation2], %s1675_s11 }
  0x51   : > { %1972 = dma.done.wait (%p2467_p5), %s224_s12, 1024  }
  0x52   : > { %1974 = vsyncadd (%p2467_p5), %s224_s12, 4294966272  ;;  %p2468_p11 = scmp.eq.s32.totalorder %s2062_s22, 0 }
  0x54   : > { %1976 = dma.done.wait (%p2468_p11), [#allocation6], 256   ;;  %p2469_p2 = pmov %p2468_p11 }
  0x55   : > { %vm268_vm0 = vcmask 130048   ;;  %v266_v0 = vld [vmem:[%s2451_s1] sm:$0xff]  ;;  %v267_v1 = vld [vmem:[%s2451_s1 + $0x8] sm:$0xff]  ;;  %v260_v5 = vld [vmem:[%s227_s7 + $0x10] sm:$0xff]  ;;  %v2003_v54 = vmov 0.0   ;;  %v854_v63 = vlaneseq  ;;  %s2006_s24 = smov 64  }
  0x56   : > { %1978 = vsyncadd (%p2469_p2), [#allocation6], 4294967040  ;;  %v258_v2 = vld [vmem:[%s227_s7] sm:$0xff]  ;;  %v1793_v3 = vpack.c.bf16 %v267_v1, %v266_v0  ;;  %v259_v4 = vld [vmem:[%s227_s7 + $0x8] sm:$0xff]  ;;  %v2004_v61 = vmov 1983009808  }
  0x57   : > { %1753 = vmatprep.mubr.msk.f32.mxu0 %vm268_vm0, %v258_v2  ;;  %v261_v6 = vld [vmem:[%s227_s7 + $0x18] sm:$0xff]  ;;  %v262_v7 = vld [vmem:[%s227_s7 + $0x20] sm:$0xff]  ;;  %v263_v8 = vld [vmem:[%s227_s7 + $0x28] sm:$0xff]  ;;  %v852_v62 = vunpack.c.l.s4 %v2004_v61  ;;  %v2005_v1 = vmov 1934713408   ;;  %s2007_s6 = smov 32  }
  0x58   : > { %1794 = vmatprep.subr.bf16.mxu0 %v1793_v3  ;;  %v264_v9 = vld [vmem:[%s227_s7 + $0x30] sm:$0xff]  ;;  %v265_v10 = vld [vmem:[%s227_s7 + $0x38] sm:$0xff]  ;;  %v526_v12 = vld [vmem:[#allocation5] sm:$0xff]  ;;  %v884_v2 = vunpack.c.l.s4 %v2005_v1  ;;  %s2008_s15 = smov 96   ;;  %vm1217_vm1 = vcmask 261120   ;;  %vm1219_vm2 = vcmask 523264  }
  0x59   : > { %1796 = vmatpush3.bf16.msra.mxu0 %v1793_v3  ;;  %v527_v13 = vld [vmem:[#allocation5 + $0x8] sm:$0xff]  ;;  %v853_v3 = vunpack.c.0.s8 %v852_v62  ;;  %vm1221_vm3 = vcmask 785408   ;;  %vm1255_vm4 = vcmask 1043456   ;;  %vm1251_vm5 = vcmask 31744   ;;  %s257_s10 = scalar_lea.vmem [#allocation7], %s1675_s11  ;;  %s1720_s12 = sshll.u32 %s2062_s22, 10 }
  0x5a   : > { %v1797_v15 = vpack.c.bf16 %v527_v13, %v526_v12  ;;  %s1587_s7 = sshll.u32 %s257_s10, 4  ;;  %s2406_s16 = scalar_lea.hbm %s2455_s5, %s1720_s12  ;;  %s2408_s7 = int_to_ptr.vmem [resolvable:$true] %s1587_s7 }
  0x5b   : > { %s1573_s17 = scalar_lea.sflag [#allocation4], %s2186_s23  ;;  %s1927_s14 = scalar_lea.vmem %s2408_s7, 1024 }
  0x5c   : > { %1754 = vmatmul.mubr.msk.f32.vlgmr.msra.gmra.mrb[0].mxu0 %vm268_vm0, %v259_v4  ;;  %1798 = vmatprep.subr.bf16.mxu1 %v1797_v15  ;;  %v855_v4 = vshrl.u32 %v854_v63, 7  ;;  %p1928_p4 = scmp.ne.s32.totalorder %s2408_s7, %s1927_s14  ;;  %s2010_s22 = smov [#allocation7]  }
  0x5d   : > { %1756 = vmatprep.mubr.msk.f32.mxu0 %vm268_vm0, %v260_v5  ;;  %1800 = vmatpush3.bf16.msra.mxu1 %v1797_v15 }
  0x5e   : > { %p1929_p6 = pnand %p1928_p4, %p2135_p12 }
  0x60   : > { %1757 = vmatmul.mubr.msk.f32.gmra.mrb[2].mxu0 %vm268_vm0, %v261_v6  ;;  %p1930_p8 = pneg %p1929_p6 }
  0x61   : > { %1759 = vmatprep.mubr.msk.f32.mxu0 %vm268_vm0, %v262_v7  ;;  %v885_v7 = vunpack.c.0.s8 %v884_v2 }
  0x64   : > { %1760 = vmatmul.mubr.msk.f32.gmra.mrb[4].mxu0 %vm268_vm0, %v263_v8  ;;  %v2239_v8 = vsub.s32 %v853_v3, %v855_v4 }
  0x65   : > { %1762 = vmatprep.mubr.msk.f32.mxu0 %vm268_vm0, %v264_v9 }
  0x68   : > { %1763 = vmatmul.mubr.msk.f32.gmra.mrb[6].mxu0 %vm268_vm0, %v265_v10 }
  0x69   : > { %1344 = vmatprep.mubr.f32.mxu0 %v2003_v54 }
 0x12f   : > { %v1755_v11 = vpop.f32.mrb[0].mxu0 }
 0x130   : > { %v359_v14 = vpop.f32.mrb[1].mxu0 }
 0x131   : > { %398 = vxpose.xlu0.b32.start [1/2] (short) (narrow) %v359_v14, 32  ;;  %v2241_v14 = vsub.s32 %v885_v7, %v855_v4 }
 0x133   : > { %v1758_v16 = vpop.f32.mrb[2].mxu0 }
 0x134   : > { %v369_v17 = vpop.f32.mrb[3].mxu0 }
 0x135   : > { %399 = vxpose.xlu0.b32.end [2/2] (short) (narrow) %v1755_v11, 32  ;;  %430 = vxpose.xlu1.b32.start [1/2] (short) (narrow) %v369_v17, 32 }
 0x137   : > { %v1761_v18 = vpop.f32.mrb[4].mxu0 }
 0x138   : > { %v379_v19 = vpop.f32.mrb[5].mxu0 }
 0x139   : > { %431 = vxpose.xlu1.b32.end [2/2] (short) (narrow) %v1758_v16, 32 }
 0x13b   : > { %v1764_v20 = vpop.f32.mrb[6].mxu0 }
 0x13c   : > { %v389_v21 = vpop.f32.mrb[7].mxu0 }
 0x13e   : > { %462 = vxpose.xlu0.b32.start [1/2] (short) (narrow) %v379_v19, 32 }
 0x142   : > { %463 = vxpose.xlu0.b32.end [2/2] (short) (narrow) %v1761_v18, 32  ;;  %494 = vxpose.xlu1.b32.start [1/2] (short) (narrow) %v389_v21, 32 }
 0x146   : > { %495 = vxpose.xlu1.b32.end [2/2] (short) (narrow) %v1764_v20, 32 }
 0x1b1   : > { %v414_v22 = vpop.trf.xlu0 }
 0x1b2   : > { %1769 = vmatprep.mubr.msk.f32.mxu1 %vm268_vm0, %v414_v22 }
 0x1b5   : > { %v415_v23 = vpop.trf.xlu0  ;;  %v446_v24 = vpop.trf.xlu1 }
 0x1b6   : > { %1770 = vmatmul.mubr.msk.f32.vlgmr.msra.gmra.mrb[0].mxu1 %vm268_vm0, %v415_v23 }
 0x1b9   : > { %v416_v25 = vpop.trf.xlu0  ;;  %v447_v26 = vpop.trf.xlu1 }
 0x1ba   : > { %1772 = vmatprep.mubr.msk.f32.mxu1 %vm268_vm0, %v416_v25 }
 0x1bd   : > { %v417_v27 = vpop.trf.xlu0  ;;  %v448_v28 = vpop.trf.xlu1 }
 0x1be   : > { %1773 = vmatmul.mubr.msk.f32.gmra.mrb[2].mxu1 %vm268_vm0, %v417_v27 }
 0x1bf   : > { %1775 = vmatprep.mubr.msk.f32.mxu1 %vm268_vm0, %v446_v24 }
 0x1c1   : > { %v478_v29 = vpop.trf.xlu0  ;;  %v449_v30 = vpop.trf.xlu1 }
 0x1c2   : > { %1776 = vmatmul.mubr.msk.f32.gmra.mrb[4].mxu1 %vm268_vm0, %v447_v26 }
 0x1c3   : > { %1778 = vmatprep.mubr.msk.f32.mxu1 %vm268_vm0, %v448_v28 }
 0x1c5   : > { %v479_v31 = vpop.trf.xlu0  ;;  %v510_v32 = vpop.trf.xlu1 }
 0x1c6   : > { %1779 = vmatmul.mubr.msk.f32.gmra.mrb[6].mxu1 %vm268_vm0, %v449_v30 }
 0x1c7   : > { %1781 = vmatprep.mubr.msk.f32.mxu1 %vm268_vm0, %v478_v29 }
 0x1c9   : > { %v480_v33 = vpop.trf.xlu0  ;;  %v511_v34 = vpop.trf.xlu1 }
 0x1ca   : > { %1782 = vmatmul.mubr.msk.f32.gmra.mrb[8].mxu1 %vm268_vm0, %v479_v31 }
 0x1cb   : > { %1784 = vmatprep.mubr.msk.f32.mxu1 %vm268_vm0, %v480_v33 }
 0x1cd   : > { %v481_v35 = vpop.trf.xlu0  ;;  %v512_v36 = vpop.trf.xlu1 }
 0x1ce   : > { %1785 = vmatmul.mubr.msk.f32.gmra.mrb[10].mxu1 %vm268_vm0, %v481_v35 }
 0x1cf   : > { %1787 = vmatprep.mubr.msk.f32.mxu1 %vm268_vm0, %v510_v32 }
 0x1d1   : > { %v513_v37 = vpop.trf.xlu1 }
 0x1d2   : > { %1788 = vmatmul.mubr.msk.f32.gmra.mrb[12].mxu1 %vm268_vm0, %v511_v34 }
 0x1d3   : > { %1790 = vmatprep.mubr.msk.f32.mxu1 %vm268_vm0, %v512_v36 }
 0x1d6   : > { %1791 = vmatmul.mubr.msk.f32.gmra.mrb[14].mxu1 %vm268_vm0, %v513_v37 }
 0x289   : > { %v1771_v38 = vpop.f32.mrb[0].mxu1 }
 0x28a   : > { %v642_v39 = vpop.f32.mrb[1].mxu1 }
 0x28b   : > { %721 = vxpose.xlu0.b32.start [1/4] (short) (narrow) %v642_v39, 32 }
 0x28f   : > { %722 = vxpose.xlu0.b32.cont [2/4] (short) (narrow) %v1771_v38, 32 }
 0x291   : > { %v1774_v40 = vpop.f32.mrb[2].mxu1 }
 0x292   : > { %v652_v41 = vpop.f32.mrb[3].mxu1 }
 0x293   : > { %723 = vxpose.xlu0.b32.cont [3/4] (short) (narrow) %v652_v41, 32 }
 0x295   : > { %v1777_v42 = vpop.f32.mrb[4].mxu1 }
 0x296   : > { %v662_v43 = vpop.f32.mrb[5].mxu1 }
 0x297   : > { %724 = vxpose.xlu0.b32.end [4/4] (short) (narrow) %v1774_v40, 32  ;;  %753 = vxpose.xlu1.b32.start [1/4] (short) (narrow) %v662_v43, 32 }
 0x299   : > { %v1780_v44 = vpop.f32.mrb[6].mxu1 }
 0x29a   : > { %v672_v45 = vpop.f32.mrb[7].mxu1 }
 0x29b   : > { %754 = vxpose.xlu1.b32.cont [2/4] (short) (narrow) %v1777_v42, 32 }
 0x29d   : > { %v1783_v46 = vpop.f32.mrb[8].mxu1 }
 0x29e   : > { %v682_v47 = vpop.f32.mrb[9].mxu1 }
 0x29f   : > { %785 = vxpose.xlu0.b32.start [1/4] (short) (narrow) %v682_v47, 32  ;;  %755 = vxpose.xlu1.b32.cont [3/4] (short) (narrow) %v672_v45, 32 }
 0x2a1   : > { %v1786_v48 = vpop.f32.mrb[10].mxu1 }
 0x2a2   : > { %v692_v49 = vpop.f32.mrb[11].mxu1 }
 0x2a3   : > { %786 = vxpose.xlu0.b32.cont [2/4] (short) (narrow) %v1783_v46, 32  ;;  %756 = vxpose.xlu1.b32.end [4/4] (short) (narrow) %v1780_v44, 32 }
 0x2a5   : > { %v1789_v50 = vpop.f32.mrb[12].mxu1 }
 0x2a6   : > { %v702_v51 = vpop.f32.mrb[13].mxu1 }
 0x2a7   : > { %787 = vxpose.xlu0.b32.cont [3/4] (short) (narrow) %v692_v49, 32  ;;  %817 = vxpose.xlu1.b32.start [1/4] (short) (narrow) %v702_v51, 32 }
 0x2a9   : > { %v1792_v52 = vpop.f32.mrb[14].mxu1 }
 0x2aa   : > { %v712_v53 = vpop.f32.mrb[15].mxu1 }
 0x2ab   : > { %788 = vxpose.xlu0.b32.end [4/4] (short) (narrow) %v1786_v48, 32  ;;  %818 = vxpose.xlu1.b32.cont [2/4] (short) (narrow) %v1789_v50, 32 }
 0x2af   : > { %819 = vxpose.xlu1.b32.cont [3/4] (short) (narrow) %v712_v53, 32 }
 0x2b3   : > { %820 = vxpose.xlu1.b32.end [4/4] (short) (narrow) %v1792_v52, 32 }
 0x30b   : > { %v737_v55 = vpop.trf.xlu0 }
 0x30f   : > { %v738_v56 = vpop.trf.xlu0 }
 0x313   : > { %v2231_v57 = vpop.trf.xlu0 }
 0x317   : > { %v769_v58 = vpop.trf.xlu1  ;;  %v2233_v60 = vpop.trf.xlu0 }
 0x31b   : > { %v770_v59 = vpop.trf.xlu1 }
 0x31f   : > { %v2235_v0 = vpop.trf.xlu1  ;;  %v801_v5 = vpop.trf.xlu0 }
 0x320   : > { %v849_v9 = vcombine.low %v737_v55, %v801_v5  ;;  %v850_v10 = vcombine.high %v737_v55, %v801_v5 }
 0x322   : > { %v857_v15 = vrot.slane %v849_v9, %v2239_v8  ;;  %v864_v16 = vrot.slane %v850_v10, %v2239_v8 }
 0x323   : > { %v2237_v6 = vpop.trf.xlu1  ;;  %v802_v19 = vpop.trf.xlu0 }
 0x324   : > { %v917_v25 = vcombine.low %v738_v56, %v802_v19  ;;  %v918_v35 = vcombine.high %v738_v56, %v802_v19 }
 0x326   : > { %v925_v32 = vrot.slane %v917_v25, %v2239_v8  ;;  %v932_v43 = vrot.slane %v918_v35, %v2239_v8 }
 0x327   : > { %v833_v11 = vpop.trf.xlu1  ;;  %v803_v42 = vpop.trf.xlu0 }
 0x328   : > { %v865_v12 = vcombine.low %v769_v58, %v833_v11  ;;  %v866_v13 = vcombine.high %v769_v58, %v833_v11  ;;  %v985_v47 = vcombine.low %v2231_v57, %v803_v42 }
 0x32a   : > { %v873_v17 = vrot.slane %v865_v12, %v2239_v8  ;;  %v880_v18 = vrot.slane %v866_v13, %v2239_v8  ;;  %v993_v53 = vrot.slane %v985_v47, %v2239_v8 }
 0x32b   : > { %v834_v20 = vpop.trf.xlu1  ;;  %v804_v3 = vpop.trf.xlu0 }
 0x32c   : > { %v882_v21 = vcombine.high %v857_v15, %v873_v17  ;;  %v897_v22 = vcombine.low %v864_v16, %v880_v18  ;;  %v898_v23 = vcombine.high %v864_v16, %v880_v18  ;;  %v933_v24 = vcombine.low %v770_v59, %v834_v20 }
 0x32d   : > { %v881_v26 = vcombine.low %v857_v15, %v873_v17  ;;  %v934_v33 = vcombine.high %v770_v59, %v834_v20  ;;  %v986_v59 = vcombine.high %v2231_v57, %v803_v42  ;;  %v1053_v9 = vcombine.low %v2233_v60, %v804_v3 }
 0x32e   : > { %v912_v27 = vrot.slane %v898_v23, %v2241_v14  ;;  %v2249_v28 = vrot.slane %v897_v22, %v2241_v14  ;;  %v941_v29 = vrot.slane %v933_v24, %v2239_v8  ;;  %v896_v31 = vrot.slane %v882_v21, %v2241_v14 }
 0x32f   : > { %v2259_v34 = vrot.slane %v881_v26, %v2241_v14  ;;  %v835_v39 = vpop.trf.xlu1  ;;  %v948_v40 = vrot.slane %v934_v33, %v2239_v8  ;;  %v1000_v4 = vrot.slane %v986_v59, %v2239_v8  ;;  %v1061_v16 = vrot.slane %v1053_v9, %v2239_v8 }
 0x330   : > { %1138 = vrot.lane.b32.xlu1 %v912_v27, %s2006_s24  ;;  %v915_v30 = vcombine.high %v2249_v28, %v2003_v54  ;;  %v949_v36 = vcombine.low %v925_v32, %v941_v29  ;;  %v950_v37 = vcombine.high %v925_v32, %v941_v29  ;;  %v914_v38 = vcombine.high %v896_v31, %v2003_v54 }
 0x331   : > { %v913_v41 = vcombine.high %v2259_v34, %v2003_v54  ;;  %v1001_v44 = vcombine.low %v2235_v0, %v835_v39  ;;  %v965_v48 = vcombine.low %v932_v43, %v948_v40  ;;  %v966_v49 = vcombine.high %v932_v43, %v948_v40 }
 0x332   : > { %1134 = vrot.lane.b32.xlu0 %v915_v30, %s2007_s6  ;;  %v964_v45 = vrot.slane %v950_v37, %v2241_v14  ;;  %v2272_v46 = vrot.slane %v949_v36, %v2241_v14  ;;  %v916_v50 = vcombine.high %v912_v27, %v2003_v54  ;;  %v1002_v55 = vcombine.high %v2235_v0, %v835_v39 }
 0x333   : > { %v1009_v51 = vrot.slane %v1001_v44, %v2239_v8  ;;  %v980_v56 = vrot.slane %v966_v49, %v2241_v14  ;;  %v2286_v58 = vrot.slane %v965_v48, %v2241_v14  ;;  %v836_v1 = vpop.trf.xlu1  ;;  %v1054_v20 = vcombine.high %v2233_v60, %v804_v3 }
 0x334   : > { %1126 = vrot.lane.b32.xlu1 %v896_v31, %s2006_s24  ;;  %v981_v52 = vcombine.high %v2272_v46, %v2003_v54  ;;  %v982_v63 = vcombine.high %v964_v45, %v2003_v54  ;;  %v1016_v2 = vrot.slane %v1002_v55, %v2239_v8  ;;  %v1069_v5 = vcombine.low %v2237_v6, %v836_v1 }
 0x335   : > { %v1017_v61 = vcombine.low %v993_v53, %v1009_v51  ;;  %v1018_v62 = vcombine.high %v993_v53, %v1009_v51  ;;  %v983_v0 = vcombine.high %v2286_v58, %v2003_v54  ;;  %v984_v12 = vcombine.high %v980_v56, %v2003_v54  ;;  %v1244_v51 = vld [vmem:[%s2453_s3] sm:$0xff] }
 0x336   : > { %1130 = vrot.lane.b32.xlu0 %v914_v38, %s2008_s15  ;;  %v1033_v10 = vcombine.low %v1000_v4, %v1016_v2  ;;  %v1034_v11 = vcombine.high %v1000_v4, %v1016_v2  ;;  %v1077_v13 = vrot.slane %v1069_v5, %v2239_v8  ;;  %v1070_v17 = vcombine.high %v2237_v6, %v836_v1 }
 0x337   : > { %v1032_v57 = vrot.slane %v1018_v62, %v2241_v14  ;;  %v2300_v7 = vrot.slane %v1017_v61, %v2241_v14  ;;  %v1068_v25 = vrot.slane %v1054_v20, %v2239_v8  ;;  %v2009_v33 = vmov 0  }
 0x338   : > { %1122 = vrot.lane.b32.xlu1 %v913_v41, %s2007_s6  ;;  %v1048_v18 = vrot.slane %v1034_v11, %v2241_v14  ;;  %v2314_v19 = vrot.slane %v1033_v10, %v2241_v14  ;;  %v1085_v21 = vcombine.low %v1061_v16, %v1077_v13  ;;  %v1086_v22 = vcombine.high %v1061_v16, %v1077_v13 }
 0x339   : > { %v1049_v15 = vcombine.high %v2300_v7, %v2003_v54  ;;  %v1050_v23 = vcombine.high %v1032_v57, %v2003_v54  ;;  %v1084_v24 = vrot.slane %v1070_v17, %v2239_v8  ;;  %1867 = vset.pattern.permute.xlu1 %v2009_v33  ;;  %1868 = vset.pattern.permute.xlu0 %v2009_v33 }
 0x33a   : > { %1150 = vrot.lane.b32.xlu0 %v964_v45, %s2006_s24  ;;  %v1051_v6 = vcombine.high %v2314_v19, %v2003_v54  ;;  %v1100_v26 = vrot.slane %v1086_v22, %v2241_v14  ;;  %v2327_v60 = vrot.slane %v1085_v21, %v2241_v14  ;;  %v1052_v30 = vcombine.high %v1048_v18, %v2003_v54 }
 0x33b   : > { %v1101_v27 = vcombine.low %v1068_v25, %v1084_v24  ;;  %v1102_v29 = vcombine.high %v1068_v25, %v1084_v24 }
 0x33c   : > { %1142 = vrot.lane.b32.xlu1 %v916_v50, %s2008_s15  ;;  %v1117_v31 = vcombine.high %v2327_v60, %v2003_v54  ;;  %v1118_v35 = vcombine.high %v1100_v26, %v2003_v54 }
 0x33d   : > { %v1116_v8 = vrot.slane %v1102_v29, %v2241_v14  ;;  %v2337_v32 = vrot.slane %v1101_v27, %v2241_v14  ;;  %v1245_v14 = vld [vmem:[%s2454_s4] sm:$0xff] }
 0x33e   : > { %1146 = vrot.lane.b32.xlu0 %v981_v52, %s2007_s6 }
 0x33f   : > { %v1119_v36 = vcombine.high %v2337_v32, %v2003_v54  ;;  %v1120_v37 = vcombine.high %v1116_v8, %v2003_v54 }
 0x340   : > { %1162 = vrot.lane.b32.xlu1 %v980_v56, %s2006_s24 }
 0x342   : > { %1154 = vrot.lane.b32.xlu0 %v982_v63, %s2008_s15 }
 0x344   : > { %1158 = vrot.lane.b32.xlu1 %v983_v0, %s2007_s6 }
 0x346   : > { %1174 = vrot.lane.b32.xlu0 %v1032_v57, %s2006_s24 }
 0x348   : > { %1166 = vrot.lane.b32.xlu1 %v984_v12, %s2008_s15 }
 0x34a   : > { %1170 = vrot.lane.b32.xlu0 %v1049_v15, %s2007_s6 }
 0x34c   : > { %1186 = vrot.lane.b32.xlu1 %v1048_v18, %s2006_s24 }
 0x34e   : > { %1178 = vrot.lane.b32.xlu0 %v1050_v23, %s2008_s15 }
 0x350   : > { %1182 = vrot.lane.b32.xlu1 %v1051_v6, %s2007_s6 }
 0x352   : > { %1198 = vrot.lane.b32.xlu0 %v1100_v26, %s2006_s24 }
 0x354   : > { %1190 = vrot.lane.b32.xlu1 %v1052_v30, %s2008_s15 }
 0x356   : > { %1194 = vrot.lane.b32.xlu0 %v1117_v31, %s2007_s6 }
 0x358   : > { %1210 = vrot.lane.b32.xlu1 %v1116_v8, %s2006_s24  ;;  %s1931_s24 = sshll.u32 %s2010_s22, 4  ;;  %s1932_s24 = int_to_ptr.vmem [resolvable:$false] %s1931_s24 }
 0x359   : > { %p1934_p10 = scmp.lt.s32.totalorder %s2408_s7, %s1932_s24 }
 0x35a   : > { %1202 = vrot.lane.b32.xlu0 %v1118_v35, %s2008_s15 }
 0x35c   : > { %1206 = vrot.lane.b32.xlu1 %v1119_v36, %s2007_s6  ;;  %s1933_s6 = scalar_lea.vmem %s1932_s24, 2048 }
 0x35d   : > { %p1935_p13 = scmp.lt.s32.totalorder %s1933_s6, %s1927_s14 }
 0x35f   : > { %p1936_p3 = por %p1935_p13, %p1934_p10 }
 0x360   : > { %1214 = vrot.lane.b32.xlu1 %v1120_v37, %s2008_s15 }
 0x361   : > { %p1937_p7 = pnand %p1936_p3, %p1930_p8 }
 0x364   : > { %1248 = vperm.xlu1 %1867, %v1245_v14  }
 0x3a2   : > { %v1139_v38 = vpop.permute.xlu1 %1138 }
 0x3a4   : > { %v1135_v39 = vpop.permute.xlu0 %1134 }
 0x3a5   : > { %v1223_v43 = vsel %vm1217_vm1, %v2249_v28, %v1135_v39 }
 0x3a6   : > { %v1127_v40 = vpop.permute.xlu1 %1126  ;;  %v1224_v48 = vsel %vm1219_vm2, %v1223_v43, %v1139_v38 }
 0x3a8   : > { %v1131_v41 = vpop.permute.xlu0 %1130 }
 0x3aa   : > { %v1123_v42 = vpop.permute.xlu1 %1122 }
 0x3ab   : > { %v1218_v44 = vsel %vm1217_vm1, %v2259_v34, %v1123_v42 }
 0x3ac   : > { %v1151_v45 = vpop.permute.xlu0 %1150  ;;  %v1220_v47 = vsel %vm1219_vm2, %v1218_v44, %v1127_v40 }
 0x3ad   : > { %v1222_v34 = vsel %vm1221_vm3, %v1220_v47, %v1131_v41 }
 0x3ae   : > { %v1143_v49 = vpop.permute.xlu1 %1142 }
 0x3af   : > { %v1225_v50 = vsel %vm1221_vm3, %v1224_v48, %v1143_v49 }
 0x3b0   : > { %v1147_v28 = vpop.permute.xlu0 %1146  ;;  %1702 = vmatprep.subr.msk.mxu0 %vm1255_vm4, %v1225_v50 }
 0x3b1   : > { %1703 = vmatpush1.msk.msra.mxu0 %vm1255_vm4, %v1222_v34  ;;  %v1226_v59 = vsel %vm1217_vm1, %v2272_v46, %v1147_v28 }
 0x3b2   : > { %v1163_v52 = vpop.permute.xlu1 %1162  ;;  %1704 = vmatmul.mubr.msk.f32.vlgmr.msra.gmra.mrb[8].mxu0 %vm1251_vm5, %v1244_v51  ;;  %v1227_v1 = vsel %vm1219_vm2, %v1226_v59, %v1151_v45 }
 0x3b3   : > { %1415 = vmatprep.mubr.f32.mxu0 %v2003_v54 }
 0x3b4   : > { %v1155_v53 = vpop.permute.xlu0 %1154 }
 0x3b5   : > { %v1228_v0 = vsel %vm1221_vm3, %v1227_v1, %v1155_v53 }
 0x3b6   : > { %v1159_v55 = vpop.permute.xlu1 %1158 }
 0x3b7   : > { %v1229_v56 = vsel %vm1217_vm1, %v2286_v58, %v1159_v55 }
 0x3b8   : > { %v1175_v61 = vpop.permute.xlu0 %1174  ;;  %v1230_v62 = vsel %vm1219_vm2, %v1229_v56, %v1163_v52 }
 0x3ba   : > { %v1167_v63 = vpop.permute.xlu1 %1166 }
 0x3bb   : > { %v1231_v2 = vsel %vm1221_vm3, %v1230_v62, %v1167_v63 }
 0x3bc   : > { %v1171_v3 = vpop.permute.xlu0 %1170  ;;  %1705 = vmatprep.subr.msk.mxu0 %vm1255_vm4, %v1231_v2 }
 0x3bd   : > { %1706 = vmatpush1.msk.msra.mxu0 %vm1255_vm4, %v1228_v0  ;;  %v1232_v57 = vsel %vm1217_vm1, %v2300_v7, %v1171_v3 }
 0x3be   : > { %v1187_v4 = vpop.permute.xlu1 %1186  ;;  %1707 = vmatmul.mubr.msk.f32.vlgmr.msra.gmra.mrb[10].mxu0 %vm1251_vm5, %v1244_v51  ;;  %v1233_v12 = vsel %vm1219_vm2, %v1232_v57, %v1175_v61 }
 0x3bf   : > { %1486 = vmatprep.mubr.f32.mxu0 %v2003_v54 }
 0x3c0   : > { %v1179_v46 = vpop.permute.xlu0 %1178 }
 0x3c1   : > { %v1234_v15 = vsel %vm1221_vm3, %v1233_v12, %v1179_v46 }
 0x3c2   : > { %v1183_v58 = vpop.permute.xlu1 %1182 }
 0x3c3   : > { %v1235_v5 = vsel %vm1217_vm1, %v2314_v19, %v1183_v58 }
 0x3c4   : > { %v1199_v9 = vpop.permute.xlu0 %1198  ;;  %v1236_v10 = vsel %vm1219_vm2, %v1235_v5, %v1187_v4 }
 0x3c6   : > { %v1191_v11 = vpop.permute.xlu1 %1190 }
 0x3c7   : > { %v1237_v13 = vsel %vm1221_vm3, %v1236_v10, %v1191_v11 }
 0x3c8   : > { %1708 = vmatprep.subr.msk.mxu0 %vm1255_vm4, %v1237_v13  ;;  %v1195_v17 = vpop.permute.xlu0 %1194 }
 0x3c9   : > { %1709 = vmatpush1.msk.msra.mxu0 %vm1255_vm4, %v1234_v15  ;;  %v1238_v19 = vsel %vm1217_vm1, %v2327_v60, %v1195_v17 }
 0x3ca   : > { %v1211_v16 = vpop.permute.xlu1 %1210  ;;  %1710 = vmatmul.mubr.msk.f32.vlgmr.msra.gmra.mrb[12].mxu0 %vm1251_vm5, %v1244_v51  ;;  %v1239_v23 = vsel %vm1219_vm2, %v1238_v19, %v1199_v9 }
 0x3cb   : > { %1557 = vmatprep.mubr.f32.mxu0 %v2003_v54 }
 0x3cc   : > { %v1203_v20 = vpop.permute.xlu0 %1202 }
 0x3cd   : > { %v1240_v6 = vsel %vm1221_vm3, %v1239_v23, %v1203_v20 }
 0x3ce   : > { %v1207_v7 = vpop.permute.xlu1 %1206 }
 0x3cf   : > { %v1241_v18 = vsel %vm1217_vm1, %v2337_v32, %v1207_v7 }
 0x3d0   : > { %v1242_v21 = vsel %vm1219_vm2, %v1241_v18, %v1211_v16 }
 0x3d2   : > { %v1215_v22 = vpop.permute.xlu1 %1214 }
 0x3d3   : > { %v1243_v24 = vsel %vm1221_vm3, %v1242_v21, %v1215_v22 }
 0x3d4   : > { %1711 = vmatprep.subr.msk.mxu0 %vm1255_vm4, %v1243_v24 }
 0x3d5   : > { %1712 = vmatpush1.msk.msra.mxu0 %vm1255_vm4, %v1240_v6 }
 0x3d6   : > { %1713 = vmatmul.mubr.msk.f32.vlgmr.msra.gmra.mrb[14].mxu0 %vm1251_vm5, %v1244_v51 }
 0x3e3   : > { %v1249_v54 = vpop.permute.xlu1 %1248 }
 0x485   : > { %v1346_v25 = vpop.f32.mrb[8].mxu0 }
 0x486   : > { %v1348_v26 = vpop.f32.mrb[9].mxu0  ;;  %v1347_v60 = vadd.f32 %v1346_v25, %v1249_v54 }
 0x487   : > { %v1349_v27 = vadd.f32 %v1348_v26, %v1249_v54 }
 0x488   : > { %1564 = vst [vmem:[%s257_s10] sm:$0xff] %v1347_v60 }
 0x489   : > { %1565 = vst [vmem:[%s257_s10 + $0x8] sm:$0xff] %v1349_v27 }
 0x491   : > { %v1417_v29 = vpop.f32.mrb[10].mxu0 }
 0x492   : > { %v1418_v30 = vadd.f32 %v1417_v29, %v1249_v54  ;;  %v1419_v31 = vpop.f32.mrb[11].mxu0 }
 0x493   : > { %v1420_v8 = vadd.f32 %v1419_v31, %v1249_v54 }
 0x494   : > { %1566 = vst [vmem:[%s257_s10 + $0x10] sm:$0xff] %v1418_v30 }
 0x495   : > { %1567 = vst [vmem:[%s257_s10 + $0x18] sm:$0xff] %v1420_v8 }
 0x49d   : > { %v1488_v32 = vpop.f32.mrb[12].mxu0 }
 0x49e   : > { %v1489_v33 = vadd.f32 %v1488_v32, %v1249_v54  ;;  %v1490_v35 = vpop.f32.mrb[13].mxu0 }
 0x49f   : > { %v1491_v36 = vadd.f32 %v1490_v35, %v1249_v54 }
 0x4a0   : > { %1568 = vst [vmem:[%s257_s10 + $0x20] sm:$0xff] %v1489_v33 }
 0x4a1   : > { %1569 = vst [vmem:[%s257_s10 + $0x28] sm:$0xff] %v1491_v36 }
 0x4a9   : > { %v1559_v37 = vpop.f32.mrb[14].mxu0 }
 0x4aa   : > { %v1560_v14 = vadd.f32 %v1559_v37, %v1249_v54  ;;  %v1561_v38 = vpop.f32.mrb[15].mxu0 }
 0x4ab   : > { %v1562_v39 = vadd.f32 %v1561_v38, %v1249_v54 }
 0x4ac   : > { %1570 = vst [vmem:[%s257_s10 + $0x30] sm:$0xff] %v1560_v14 }
 0x4ad   : > { %1571 = vst [vmem:[%s257_s10 + $0x38] sm:$0xff] %v1562_v39 }
 0x4ae   : > { %1940 = shalt.err (!%p1937_p7)
}
 0x4af   : > { %s1941_s23 = scalar_lea.hbm %s2406_s16, 1024  ;;  %s1945_s29 = scalar_lea.hbm %s2455_s5, 2048 }
 0x4b0   : > { %p1942_p9 = scmp.ne.s32.totalorder %s2406_s16, %s1941_s23  ;;  %p1946_p5 = scmp.lt.u32.totalorder %s2406_s16, %s2455_s5 }
 0x4b1   : > { %p1947_p11 = scmp.lt.u32.totalorder %s1945_s29, %s1941_s23  ;;  %p1949_p4 = scmp.lt.u32.totalorder %s1941_s23, %s2406_s16 }
 0x4b2   : > { %p1943_p1 = pnand %p1942_p9, %p2135_p12 }
 0x4b3   : > { %p1948_p2 = por %p1947_p11, %p1946_p5 }
 0x4b4   : > { %p1944_p0 = pneg %p1943_p1 }
 0x4b5   : > { %p1950_p6 = por %p1949_p4, %p1948_p2 }
 0x4b7   : > { %p1951_p8 = pnand %p1950_p6, %p1944_p0 }
 0x4b9   : > { %1954 = shalt.err (!%p1951_p8)
}
 0x4ba   : > { %1807 = dma.vmem_to_hbm [thread:$0]  (%p2135_p12), %s2408_s7, 1024, %s2406_s16, %s1573_s17  }
 0x4bb PF: > { %s1599_s10 = sand.u32 1, %s1985_s18   ;;  %p2470_p10 = scmp.ne.s32.totalorder %s2460_s25, 0 }
 0x4bc   : > { %p2471_p13 = scmp.ge.s32.totalorder %s1997_s21, 2  ;;  %s1600_s12 = scalar_lea.sflag [#allocation4], %s1599_s10 }
 0x4be   : > { %p1818_p3 = pnand %p2471_p13, %p2470_p10 }
 0x4c0   : > { %1980 = dma.done.wait (!%p1818_p3), %s1600_s12, 1024  }
 0x4c1   : > { %1982 = vsyncadd (!%p1818_p3), %s1600_s12, 4294966272  ;;  %p19_p7 = scmp.ge.s32.totalorder %s2097_s30, 4   ;;  %s2472_s18 = smov %s1989_s19 }
 0x4c2   : > { %s2473_s19 = smov %s1993_s20  ;;  %s2474_s20 = smov %s2131_s8 }
 0x4c3   : > { %s2475_s21 = smov %s2097_s30  ;;  %21 = sbr.rel (!%p19_p7) target bundleno = 6 (0x6), region = 89 }
 0x4ca   :  { %1605 = vsyncpa [#allocation3], 1 }
 0x4cb   :  { %1607 = vsyncpa [#allocation3 + $0x1], 1 }
 0x4cc   :  { %1608 = vsyncpa [#allocation6], 1 }
 0x4cd   :  { %1609 = vsyncpa [#allocation4], 1 }
 0x4ce   :  { %1611 = vsyncpa [#allocation4 + $0x1], 1 }

</bundles_post_ra>
